<compile_context>
chip_gen: v7x
topology: tpu7x:2x2x1
jax: 0.10.0
libtpu: 0.0.40
codegen_flags: <defaults>
</compile_context>

<pallas_src>
import jax
import jax.numpy as jnp
from jax.experimental import pallas as pl
from jax.experimental.pallas import tpu as pltpu

MARGIN = 2.0        # module default
EPS = 1e-6          # torch.nn.functional.pairwise_distance default eps


def _round_up(x: int, m: int) -> int:
    return (x + m - 1) // m * m


def _cdiv(a: int, b: int) -> int:
    return -(-a // b)


def _vmem_capacity_bytes() -> int:
    try:
        return int(pltpu.get_tpu_info().vmem_capacity_bytes)
    except Exception:
        return 64 * 1024 * 1024  # conservative default (v7x-sized)


def contrastive_loss(output1, output2, label, *, margin=MARGIN, tb=None):
    """output1, output2: (B, D) float arrays; label: (B,) 0/1 array."""
    B, D = output1.shape
    itemsize = jnp.dtype(output1.dtype).itemsize

    vmem_cap = _vmem_capacity_bytes()
    # Per-generation step-payload target: ~6 MiB on 64-MiB-VMEM chips (v7x,
    # faster HBM), ~4 MiB on 128-MiB-VMEM chips (v5e/v6e).
    target_step = (6 << 20) if vmem_cap <= (96 << 20) else (4 << 20)
    input_budget = int(0.6 * vmem_cap)

    step_row_bytes = 2 * D * itemsize                       # both inputs, 1 row / step
    resident_row_bytes = 2 * 2 * D * itemsize + 4 * D * 4   # dbl-buffered inputs + f32 temps

    if tb is None:
        tb = max(8, (target_step // step_row_bytes) // 8 * 8)
        tb = min(tb, max(8, (input_budget // resident_row_bytes) // 8 * 8))
    tb = max(8, min(_round_up(tb, 8), _round_up(B, 8)))

    nb = _cdiv(B, tb)                 # number of batch tiles
    nc = 2 if nb >= 2 else 1          # leading "parallel" axis (both TCs on v7x)
    nb_inner = _cdiv(nb, nc)

    need_row_mask = (B % tb != 0) or (nc * nb_inner != nb)

    lab = label.reshape(B, 1).astype(jnp.float32)
    inv_b = 1.0 / float(B)

    def kernel(o1_ref, o2_ref, lab_ref, out_ref, acc_ref):
        i = pl.program_id(1)

        @pl.when(i == 0)
        def _init():
            acc_ref[...] = jnp.zeros_like(acc_ref)

        # Cast per-tile in-register (DMA stays at input width).
        x1 = o1_ref[...].astype(jnp.float32)
        x2 = o2_ref[...].astype(jnp.float32)
        diff = x1 - x2 + EPS                                   # (tb, D)

        d2 = jnp.sum(diff * diff, axis=-1, keepdims=True)      # (tb, 1) squared dist
        d = jnp.sqrt(d2)                                       # only for the hinge term
        lbl = lab_ref[...].astype(jnp.float32)                 # (tb, 1)
        hinge = jnp.maximum(margin - d, 0.0)
        loss = (1.0 - lbl) * d2 + lbl * (hinge * hinge)        # (tb, 1)

        if need_row_mask:
            # Mask must stay the LAST op before accumulation: garbage rows
            # (partial tail tile, clamped duplicate tiles) are discarded here.
            c = pl.program_id(0)
            tile = c * nb_inner + i
            row = tile * tb + jax.lax.broadcasted_iota(jnp.int32, (tb, 1), 0)
            loss = jnp.where(row < B, loss, 0.0)

        acc_ref[...] += loss                                   # elementwise (tb, 1)

        @pl.when(i == pl.num_programs(1) - 1)
        def _finalize():
            total = jnp.sum(acc_ref[...])                      # one sublane reduce / core
            out_ref[...] = jnp.full(out_ref.shape, total, dtype=jnp.float32)

    def data_index(c, i):
        # Clamp: duplicate tiles produced by the clamp are fully row-masked.
        return (jnp.minimum(c * nb_inner + i, nb - 1), 0)

    step_bytes = tb * step_row_bytes
    triple = (step_bytes < (1 << 20)) and (nb_inner >= 3)
    big_kwargs = {"pipeline_mode": pl.Buffered(3)} if triple else {}

    n_buf = 3 if triple else 2
    in_buf_bytes = 2 * n_buf * tb * D * itemsize
    temp_bytes = 4 * tb * D * 4
    vmem_limit = int(1.3 * (in_buf_bytes + temp_bytes)) + (2 << 20)
    vmem_limit = max(vmem_limit, 16 << 20)
    vmem_limit = min(vmem_limit, int(0.85 * vmem_cap))

    out = pl.pallas_call(
        kernel,
        out_shape=jax.ShapeDtypeStruct((nc, 8, 128), jnp.float32),
        grid=(nc, nb_inner),
        in_specs=[
            pl.BlockSpec((tb, D), data_index, **big_kwargs),
            pl.BlockSpec((tb, D), data_index, **big_kwargs),
            pl.BlockSpec((tb, 1), data_index),
        ],
        out_specs=pl.BlockSpec((1, 8, 128), lambda c, i: (c, 0, 0)),
        scratch_shapes=[pltpu.VMEM((tb, 1), jnp.float32)],
        compiler_params=pltpu.CompilerParams(
            dimension_semantics=("parallel", "arbitrary"),
            vmem_limit_bytes=int(vmem_limit),
        ),
    )(output1, output2, lab)

    partials = out[:, 0, 0]                 # one partial sum per core
    return jnp.sum(partials) * inv_b


def contrastive_loss_ref(output1, output2, label, margin=MARGIN):
    """Plain-JAX reference mirroring the PyTorch forward."""
    diff = output1.astype(jnp.float32) - output2.astype(jnp.float32) + EPS
    d = jnp.sqrt(jnp.sum(diff * diff, axis=-1))
    lab = label.astype(jnp.float32)
    return jnp.mean((1.0 - lab) * d**2 + lab * jnp.maximum(margin - d, 0.0) ** 2)


if __name__ == "__main__":
    key = jax.random.PRNGKey(0)
    k1, k2, k3 = jax.random.split(key, 3)

    # Small siamese-embedding-sized inputs (single-tile path).
    B, D = 8, 32
    output1 = jax.random.normal(k1, (B, D), dtype=jnp.float32)
    output2 = jax.random.normal(k2, (B, D), dtype=jnp.float32)
    label = jax.random.bernoulli(k3, p=0.5, shape=(B,)).astype(jnp.float32)

    loss = jax.block_until_ready(contrastive_loss(output1, output2, label))
    ref = contrastive_loss_ref(output1, output2, label)
    assert jnp.allclose(loss, ref, rtol=1e-5, atol=1e-5), (loss, ref)

    # Multi-tile path: grid > 1, dual "core" axis, tail-row masking, clamped
    # duplicate tile, unaligned D — with a small forced tile size.
    B2, D2 = 20, 32
    o1b = jax.random.normal(k1, (B2, D2), dtype=jnp.float32)
    o2b = jax.random.normal(k2, (B2, D2), dtype=jnp.float32)
    labb = jax.random.bernoulli(k3, p=0.5, shape=(B2,)).astype(jnp.float32)
    loss2 = jax.block_until_ready(contrastive_loss(o1b, o2b, labb, tb=8))
    ref2 = contrastive_loss_ref(o1b, o2b, labb)
    assert jnp.allclose(loss2, ref2, rtol=1e-5, atol=1e-5), (loss2, ref2)

    print("KERNEL_OK")
</pallas_src>

<mosaic_0001>
module attributes {stable_mosaic.version = 11 : i64} {
  func.func @kernel(%arg0: i32, %arg1: i32, %arg2: memref<8x32xf32, #tpu.memory_space<vmem>>, %arg3: memref<8x32xf32, #tpu.memory_space<vmem>>, %arg4: memref<8x1xf32, #tpu.memory_space<vmem>>, %arg5: memref<1x8x128xf32, #tpu.memory_space<vmem>>, %arg6: memref<8x1xf32, #tpu.memory_space<vmem>>) attributes {dimension_semantics = [#tpu.dimension_semantics<parallel>, #tpu.dimension_semantics<arbitrary>], iteration_bounds = array<i64: 1, 1>, scalar_prefetch = 0 : i64, scratch_operands = 1 : i64, tpu.core_type = #tpu.core_type<tc>, window_params = [{transform_indices = @transform_0, window_bounds = array<i64: 8, 32>}, {transform_indices = @transform_1, window_bounds = array<i64: 8, 32>}, {transform_indices = @transform_2, window_bounds = array<i64: 8, 1>}, {transform_indices = @transform_3, window_bounds = array<i64: 1, 8, 128>}]} {
    %c0_i32 = arith.constant 0 : i32
    %0 = arith.cmpi eq, %arg1, %c0_i32 : i32
    %1 = arith.extui %0 : i1 to i32
    %c0_i32_0 = arith.constant 0 : i32
    %2 = arith.cmpi ne, %1, %c0_i32_0 : i32
    scf.if %2 {
      %cst_16 = arith.constant 0.000000e+00 : f32
      %29 = vector.broadcast %cst_16 : f32 to vector<8x1xf32>
      %c0_17 = arith.constant 0 : index
      %c0_18 = arith.constant 0 : index
      %30 = vector.load %arg6[%c0_17, %c0_18] : memref<8x1xf32, #tpu.memory_space<vmem>>, vector<8x1xf32>
      tpu.vector_store %arg6[%c0_17, %c0_18], %29 {strides = array<i32>} : memref<8x1xf32, #tpu.memory_space<vmem>>, vector<8x1xf32>,
    } else {
    }
    %c0 = arith.constant 0 : index
    %c0_1 = arith.constant 0 : index
    %3 = vector.load %arg2[%c0, %c0_1] : memref<8x32xf32, #tpu.memory_space<vmem>>, vector<8x32xf32>
    %c0_2 = arith.constant 0 : index
    %c0_3 = arith.constant 0 : index
    %4 = vector.load %arg3[%c0_2, %c0_3] : memref<8x32xf32, #tpu.memory_space<vmem>>, vector<8x32xf32>
    %5 = arith.subf %3, %4 : vector<8x32xf32>
    %cst = arith.constant 9.99999997E-7 : f32
    %6 = vector.broadcast %cst : f32 to vector<8x32xf32>
    %7 = arith.addf %5, %6 : vector<8x32xf32>
    %8 = arith.mulf %7, %7 : vector<8x32xf32>
    %cst_4 = arith.constant dense<0.000000e+00> : vector<8xf32>
    %9 = vector.multi_reduction <add>, %8, %cst_4 [1] : vector<8x32xf32> to vector<8xf32>
    %10 = vector.shape_cast %9 : vector<8xf32> to vector<8x1xf32>
    %11 = math.sqrt %10 : vector<8x1xf32>
    %c0_5 = arith.constant 0 : index
    %c0_6 = arith.constant 0 : index
    %12 = vector.load %arg4[%c0_5, %c0_6] : memref<8x1xf32, #tpu.memory_space<vmem>>, vector<8x1xf32>
    %cst_7 = arith.constant 2.000000e+00 : f32
    %13 = vector.broadcast %cst_7 : f32 to vector<8x1xf32>
    %14 = arith.subf %13, %11 : vector<8x1xf32>
    %cst_8 = arith.constant 0.000000e+00 : f32
    %15 = vector.broadcast %cst_8 : f32 to vector<8x1xf32>
    %16 = arith.maximumf %14, %15 : vector<8x1xf32>
    %cst_9 = arith.constant 1.000000e+00 : f32
    %17 = vector.broadcast %cst_9 : f32 to vector<8x1xf32>
    %18 = arith.subf %17, %12 : vector<8x1xf32>
    %19 = arith.mulf %18, %10 : vector<8x1xf32>
    %20 = arith.mulf %16, %16 : vector<8x1xf32>
    %21 = arith.mulf %12, %20 : vector<8x1xf32>
    %22 = arith.addf %19, %21 : vector<8x1xf32>
    %c0_10 = arith.constant 0 : index
    %c0_11 = arith.constant 0 : index
    %23 = vector.load %arg6[%c0_10, %c0_11] : memref<8x1xf32, #tpu.memory_space<vmem>>, vector<8x1xf32>
    %24 = arith.addf %23, %22 : vector<8x1xf32>
    %c0_12 = arith.constant 0 : index
    %c0_13 = arith.constant 0 : index
    %25 = vector.load %arg6[%c0_12, %c0_13] : memref<8x1xf32, #tpu.memory_space<vmem>>, vector<8x1xf32>
    tpu.vector_store %arg6[%c0_12, %c0_13], %24 {strides = array<i32>} : memref<8x1xf32, #tpu.memory_space<vmem>>, vector<8x1xf32>,
    %c0_i32_14 = arith.constant 0 : i32
    %26 = arith.cmpi eq, %arg1, %c0_i32_14 : i32
    %27 = arith.extui %26 : i1 to i32
    %c0_i32_15 = arith.constant 0 : i32
    %28 = arith.cmpi ne, %27, %c0_i32_15 : i32
    scf.if %28 {
      %c0_16 = arith.constant 0 : index
      %c0_17 = arith.constant 0 : index
      %29 = vector.load %arg6[%c0_16, %c0_17] : memref<8x1xf32, #tpu.memory_space<vmem>>, vector<8x1xf32>
      %30 = vector.shape_cast %29 : vector<8x1xf32> to vector<1x8x1xf32>
      %cst_18 = arith.constant dense<0.000000e+00> : vector<1xf32>
      %31 = vector.multi_reduction <add>, %30, %cst_18 [1, 2] : vector<1x8x1xf32> to vector<1xf32>
      %32 = vector.shape_cast %31 : vector<1xf32> to vector<1x1x1xf32>
      %33 = vector.extract %32[0, 0, 0] : f32 from vector<1x1x1xf32>
      %34 = vector.broadcast %33 : f32 to vector<1x8x128xf32>
      %c0_19 = arith.constant 0 : index
      %c0_20 = arith.constant 0 : index
      %c0_21 = arith.constant 0 : index
      %35 = vector.load %arg5[%c0_19, %c0_20, %c0_21] : memref<1x8x128xf32, #tpu.memory_space<vmem>>, vector<1x8x128xf32>
      tpu.vector_store %arg5[%c0_19, %c0_20, %c0_21], %34 {strides = array<i32>} : memref<1x8x128xf32, #tpu.memory_space<vmem>>, vector<1x8x128xf32>,
    } else {
    }
    return
  }
  func.func @transform_0(%arg0: i32, %arg1: i32) -> (i32, i32) {
    %c1_i32 = arith.constant 1 : i32
    %0 = arith.muli %arg0, %c1_i32 : i32
    %1 = arith.addi %0, %arg1 : i32
    %c0_i32 = arith.constant 0 : i32
    %2 = arith.minsi %1, %c0_i32 : i32
    %c0_i32_0 = arith.constant 0 : i32
    %c0_i32_1 = arith.constant 0 : i32
    return %2, %c0_i32_0 : i32, i32
  }
  func.func @transform_1(%arg0: i32, %arg1: i32) -> (i32, i32) {
    %c1_i32 = arith.constant 1 : i32
    %0 = arith.muli %arg0, %c1_i32 : i32
    %1 = arith.addi %0, %arg1 : i32
    %c0_i32 = arith.constant 0 : i32
    %2 = arith.minsi %1, %c0_i32 : i32
    %c0_i32_0 = arith.constant 0 : i32
    %c0_i32_1 = arith.constant 0 : i32
    return %2, %c0_i32_0 : i32, i32
  }
  func.func @transform_2(%arg0: i32, %arg1: i32) -> (i32, i32) {
    %c1_i32 = arith.constant 1 : i32
    %0 = arith.muli %arg0, %c1_i32 : i32
    %1 = arith.addi %0, %arg1 : i32
    %c0_i32 = arith.constant 0 : i32
    %2 = arith.minsi %1, %c0_i32 : i32
    %c0_i32_0 = arith.constant 0 : i32
    %c0_i32_1 = arith.constant 0 : i32
    return %2, %c0_i32_0 : i32, i32
  }
  func.func @transform_3(%arg0: i32, %arg1: i32) -> (i32, i32, i32) {
    %c0_i32 = arith.constant 0 : i32
    %c0_i32_0 = arith.constant 0 : i32
    %c0_i32_1 = arith.constant 0 : i32
    return %arg0, %c0_i32, %c0_i32_0 : i32, i32, i32
  }
}

</mosaic_0001>

<bundles_post_ra>
// kernel: tpu_custom_call.1
= control target key start
LH: loop header
LB: loop body
LE: loop exit
PB: predicated region body
PF: predicated region fallthrough
CT: control target
= control target key end

     0   :  { %8 = vsyncpa [#allocation4], 0  ;;  %s279_s0 = inlined_call_operand.vmem [shape: f32[8,32], index: 0, kind: input, shape index: {}]   ;;  %s280_s1 = inlined_call_operand.hbm [shape: f32[8,32], index: 1, kind: input, shape index: {}]   ;;  %s281_s2 = inlined_call_operand.vmem [shape: f32[8,1], index: 2, kind: input, shape index: {}]   ;;  %s282_s3 = inlined_call_operand.hbm [shape: f32[1,8,128], index: 3, kind: output, shape index: {}]  }
   0x1   :  { %9 = vsyncpa [#allocation5], 0  ;;  %s223_s12 = smov [#allocation3]   ;;  %s175_s16 = scalar_lea.hbm %s280_s1, 128 }
   0x2   :  { %s33_s13 = sshll.u32 %s223_s12, 4  ;;  %p176_p0 = scmp.ne.s32.totalorder %s280_s1, %s175_s16  ;;  %s34_s13 = int_to_ptr.vmem [resolvable:$true] %s33_s13 }
   0x3   :  { %p179_p1 = scmp.lt.u32.totalorder %s175_s16, %s280_s1 }
   0x5   :  { %p181_p2 = pnand %p179_p1, %p176_p0 }
   0x7   :  { %184 = shalt.err (!%p181_p2)
}
   0x8   :  { %s185_s21 = scalar_lea.vmem %s34_s13, 128  ;;  %p190_p4 = scmp.lt.s32.totalorder %s34_s13, %s34_s13 }
   0x9   :  { %p186_p3 = scmp.ne.s32.totalorder %s34_s13, %s185_s21  ;;  %p191_p5 = scmp.lt.s32.totalorder %s185_s21, %s185_s21 }
   0xb   :  { %p192_p6 = por %p191_p5, %p190_p4 }
   0xd   :  { %p193_p7 = pnand %p192_p6, %p186_p3 }
   0xf   :  { %196 = shalt.err (!%p193_p7)
}
  0x10   :  { %36 = dma.hbm_to_vmem [thread:$0]  %s280_s1, 128, %s34_s13, [#allocation4]  }
  0x11   :  { %219 = dma.done.wait [#allocation4], 128  }
  0x12   :  { %220 = vsyncadd [#allocation4], 4294967168  ;;  %v95_v0 = vld [vmem:[%s279_s0] sm:$0xff]  ;;  %v96_v1 = vld [vmem:[#allocation3] sm:$0xff]  ;;  %vm100_vm0 = vcmask 261120   ;;  %vm93_vm1 = vcmask 7168  }
  0x13   :  { %v97_v2 = vsub.f32 %v95_v0, %v96_v1  ;;  %v224_v6 = vmov 0.0   ;;  %v111_v12 = vld [vmem:[%s281_s2] sm:$0xff]  ;;  %s225_s2 = smov [#allocation6]  }
  0x14   :  { %94 = vst.msk [vmem:[#allocation2] sm:$0xff] %vm93_vm1, %v224_v6  ;;  %v114_v15 = vsub.f32 1.0, %v111_v12  ;;  %s145_s26 = sshll.u32 %s225_s2, 4  ;;  %s146_s26 = int_to_ptr.vmem [resolvable:$true] %s145_s26 }
  0x15   :  { %v98_v3 = vadd.f32 1e-06, %v97_v2  ;;  %s197_s28 = scalar_lea.vmem %s146_s26, 128  ;;  %p202_p9 = scmp.lt.s32.totalorder %s146_s26, %s146_s26 }
  0x16   :  { %p198_p8 = scmp.ne.s32.totalorder %s146_s26, %s197_s28  ;;  %p203_p10 = scmp.lt.s32.totalorder %s197_s28, %s197_s28 }
  0x17   :  { %v99_v4 = vmul.f32 %v98_v3, %v98_v3 }
  0x18   :  { %p204_p11 = por %p203_p10, %p202_p9 }
  0x19   :  { %v101_v5 = vsel %vm100_vm0, %v99_v4, 0.0 }
  0x1a   :  { %102 = vadd.xlane.f32.xlu0 %v101_v5  ;;  %p205_p12 = pnand %p204_p11, %p198_p8 }
  0x1b   :  { %v119_v20 = vld [vmem:[#allocation2] sm:$0xff] }
  0xa7   :  { %v103_v7 = vpop.xlane.xlu0 %102 }
  0xa8   :  { %173 = vrsqrt.f32 %v103_v7  ;;  %vm106_vm2 = vcmp.eq.f32.partialorder %v103_v7, inf  ;;  %v109_v10 = vand.u32 2147483648, %v103_v7  ;;  %vm108_vm3 = vcmp.eq.f32.partialorder %v103_v7, 0.0 }
  0xa9   :  { %v115_v18 = vmul.f32 %v114_v15, %v103_v7 }
  0xb2   :  { %v174_v8 = vpop.eup %173 }
  0xb3   :  { %v105_v9 = vmul.f32 %v174_v8, %v103_v7 }
  0xb5   :  { %v107_v11 = vsel %vm106_vm2, %v103_v7, %v105_v9 }
  0xb6   :  { %v110_v13 = vsel %vm108_vm3, %v109_v10, %v107_v11 }
  0xb7   :  { %v112_v14 = vsub.f32 2.0, %v110_v13 }
  0xb9   :  { %v113_v16 = vmax.f32 %v112_v14, 0.0 }
  0xbb   :  { %v116_v17 = vmul.f32 %v113_v16, %v113_v16 }
  0xbd   :  { %v117_v19 = vmul.f32 %v116_v17, %v111_v12 }
  0xbf   :  { %v118_v21 = vadd.f32 %v117_v19, %v115_v18 }
  0xc1   :  { %v120_v22 = vadd.f32 %v119_v20, %v118_v21 }
  0xc3   :  { %122 = vst.msk [vmem:[#allocation2] sm:$0xff] %vm93_vm1, %v120_v22 }
  0xca   :  { %v126_v23 = vld [vmem:[#allocation2] sm:$0xff] }
  0xcb   :  { %v127_v24 = vsel %vm93_vm1, %v126_v23, 0.0 }
  0xcc   :  { %128 = vadd.xlane.f32.xlu0 %v127_v24 }
 0x159   :  { %v129_v25 = vpop.xlane.xlu0 %128 }
 0x15a   :  { %v130_v26 = vrot.slane %v129_v25, 4 }
 0x15c   :  { %v131_v27 = vadd.f32 %v130_v26, %v129_v25 }
 0x15e   :  { %v132_v28 = vrot.slane %v131_v27, 2 }
 0x160   :  { %v133_v29 = vadd.f32 %v132_v28, %v131_v27 }
 0x162   :  { %v134_v30 = vrot.slane %v133_v29, 1 }
 0x164   :  { %v135_v31 = vadd.f32 %v134_v30, %v133_v29 }
 0x166   :  { %168 = vpush %v135_v31 }
 0x197   :  { %s169_s27 = spop %168 }
 0x198   :  { %v137_v32 = vstv %s169_s27 }
 0x199   :  { %138 = vst [vmem:[#allocation6] sm:$0xff] %v137_v32 }
 0x19a   :  { %208 = shalt.err (!%p205_p12)
}
 0x19b   :  { %s209_s4 = scalar_lea.hbm %s282_s3, 128 }
 0x19c   :  { %p210_p13 = scmp.ne.s32.totalorder %s282_s3, %s209_s4  ;;  %p213_p0 = scmp.lt.u32.totalorder %s209_s4, %s282_s3 }
 0x19e   :  { %p215_p1 = pnand %p213_p0, %p210_p13 }
 0x1a0   :  { %218 = shalt.err (!%p215_p1)
}
 0x1a1   :  { %148 = dma.vmem_to_hbm [thread:$0]  %s146_s26, 128, %s282_s3, [#allocation5]  }
 0x1a2   :  { %221 = dma.done.wait [#allocation5], 128  }
 0x1a3   :  { %222 = vsyncadd [#allocation5], 4294967168 }
 0x1a4   :  { %152 = vsyncpa [#allocation4], 1 }
 0x1a5   :  { %153 = vsyncpa [#allocation5], 1 }

</bundles_post_ra>
